<compile_context>
chip_gen: v7x
topology: tpu7x:2x2x1
jax: 0.10.0
libtpu: 0.0.40
codegen_flags: <defaults>
</compile_context>

<pallas_src>
import functools

import jax
import jax.numpy as jnp
from jax.experimental import pallas as pl
from jax.experimental.pallas import tpu as pltpu

LANE = 128
SUB = 8


def _dice_partial_kernel(*args, class_ids, n_inner, masked, first_pad_tile):
    """One (batch, outer, inner) grid step.

    args = (x_ref_0, ..., x_ref_{K-1}, lab_ref, out_ref)
      x_ref_k : (1, 1, tr, 128) logits plane of selected class k (any float dtype)
      lab_ref : (1, tr, 128)    integer labels (-1 marks padded pixels)
      out_ref : (1, K*3*8, 128) f32 per-(batch, outer) partials, rows
                [k*24+0 : k*24+8]  = sum(p_k * t_k)
                [k*24+8 : k*24+16] = sum(p_k)
                [k*24+16: k*24+24] = sum(t_k)
    """
    K = len(class_ids)
    x_refs = args[:K]
    lab_ref = args[K]
    out_ref = args[K + 1]

    i = pl.program_id(2)

    @pl.when(i == 0)
    def _init():
        out_ref[...] = jnp.zeros_like(out_ref)

    lab = lab_ref[0].astype(jnp.int32)                         # (tr, 128)

    # Softmax over the K selected planes: pixels sit on full (sublane, lane) vregs,
    # so max / exp / sum are pure elementwise VPU + EUP work (no cross-lane XLU).
    xs = [x_refs[k][0, 0].astype(jnp.float32) for k in range(K)]
    m = xs[0]
    for xk in xs[1:]:
        m = jnp.maximum(m, xk)
    es = [jnp.exp(xk - m) for xk in xs]
    s = es[0]
    for ek in es[1:]:
        s = s + ek
    # EUP approximate reciprocal + one Newton step (rel. err ~1e-8) instead of K divides.
    r0 = pl.reciprocal(s, approx=True)
    r = r0 * (2.0 - s * r0)

    def _fold(a):
        # (tr, 128) -> (8, 128) partial sum with plain vreg adds (static slices only).
        acc = a[0:SUB, :]
        for s0 in range(SUB, a.shape[0], SUB):
            acc = acc + a[s0:s0 + SUB, :]
        return acc

    def _accumulate(rr):
        for k, c in enumerate(class_ids):
            p_k = es[k] * rr                                   # softmax prob of class c
            t_k = (lab == c).astype(jnp.float32)               # one-hot ground truth
            base = 3 * SUB * k
            out_ref[0, base:base + SUB, :] += _fold(p_k * t_k)
            out_ref[0, base + SUB:base + 2 * SUB, :] += _fold(p_k)
            out_ref[0, base + 2 * SUB:base + 3 * SUB, :] += _fold(t_k)

    if masked:
        # Padding only exists in tiles >= first_pad_tile; earlier tiles skip the mask.
        tile = pl.program_id(1) * n_inner + i

        @pl.when(tile < first_pad_tile)
        def _no_pad():
            _accumulate(r)

        @pl.when(tile >= first_pad_tile)
        def _with_pad():
            _accumulate(r * (lab >= 0).astype(jnp.float32))
    else:
        _accumulate(r)


def _largest_divisor_tile(rows, cap, align):
    """Largest t <= cap with t % align == 0 and rows % t == 0; 0 if none exists."""
    cap = min(cap, rows)
    cap -= cap % align
    t = cap
    while t >= align:
        if rows % t == 0:
            return t
        t -= align
    return 0


def custom_soft_dice_loss(logits, target, class_ids, n_classes, smooth=0.01,
                          *, compute_dtype=jnp.bfloat16, max_tile_rows=1024):
    """Forward pass of CustomSoftDiceLoss.

    logits: (B, C, H, W) float; target: (B, 1, H, W) integer class labels.
    Semantics: softmax over the `class_ids` channels, per-(batch, class) soft dice,
               loss = 1 - sum(dice) / (B * n_classes).
    """
    B, C, H, W = logits.shape
    class_ids = tuple(int(c) for c in class_ids)
    K = len(class_ids)
    N = H * W

    lab_flat = target.reshape(B, N)

    # ------------------------------ choose layout -------------------------------
    rows = N // LANE
    tr_a = 0
    if N % LANE == 0:
        itemsize = jnp.dtype(logits.dtype).itemsize
        align = SUB * max(1, 4 // itemsize)        # sublane packing of the raw logits
        tr_a = _largest_divisor_tile(rows, max_tile_rows, align)

    if tr_a and tr_a >= min(rows, 256):
        # Path A: the spatial extent tiles cleanly -> read the caller's logits in
        # place (free reshape).  Only the K selected planes are DMA'd; no cast/pad
        # pass (a standalone bf16-cast pass would cost more HBM than it saves —
        # pass bf16 logits in if the producer can emit them).
        tr, num_tiles = tr_a, rows // tr_a
        x = logits.reshape(B, C, rows, LANE)
        chans = class_ids                          # plane index inside `x`
        masked, first_pad_tile = False, num_tiles
        lab_dtype = jnp.int8 if (tr % 32 == 0 and n_classes <= 127) else jnp.int32
        lab = lab_flat.astype(lab_dtype).reshape(B, rows, LANE)
    else:
        # Path B: ragged extent -> one fused select-K + cast + pad pass
        # (bf16 logits, int8 labels; padding masked in-kernel via label == -1).
        ROW_ALIGN = 32                             # covers bf16 (16) and int8 (32) packing
        rows_b = pl.cdiv(N, LANE)
        rows_b = pl.cdiv(rows_b, ROW_ALIGN) * ROW_ALIGN
        tr = min(rows_b, max_tile_rows)
        num_tiles = pl.cdiv(rows_b, tr)
        if B == 1 and num_tiles > 1:
            num_tiles = pl.cdiv(num_tiles, 2) * 2  # even tile count -> spatial megacore split
        rows_p = num_tiles * tr
        n_pad = rows_p * LANE

        xsel = logits[:, list(class_ids), :, :].astype(compute_dtype).reshape(B, K, N)
        x = jnp.pad(xsel, ((0, 0), (0, 0), (0, n_pad - N))).reshape(B, K, rows_p, LANE)
        chans = tuple(range(K))
        masked = n_pad != N
        first_pad_tile = (N // LANE) // tr
        lab_dtype = jnp.int8 if n_classes <= 127 else jnp.int32
        lab = jnp.pad(lab_flat.astype(lab_dtype), ((0, 0), (0, n_pad - N)),
                      constant_values=-1).reshape(B, rows_p, LANE)

    # Split spatial tiles into (outer parallel, inner arbitrary) so a single-batch
    # call still gives the v7x megacore two parallel work items.
    outer = 2 if (B == 1 and num_tiles >= 2 and num_tiles % 2 == 0) else 1
    inner = num_tiles // outer

    kernel = functools.partial(
        _dice_partial_kernel, class_ids=class_ids, n_inner=inner,
        masked=masked, first_pad_tile=first_pad_tile)

    def _x_spec(c):
        return pl.BlockSpec(
            (1, 1, tr, LANE),
            lambda b, o, i, c=c, n_in=inner: (b, c, o * n_in + i, 0))

    out = pl.pallas_call(
        kernel,
        out_shape=jax.ShapeDtypeStruct((B * outer, K * 3 * SUB, LANE), jnp.float32),
        grid_spec=pltpu.PrefetchScalarGridSpec(
            num_scalar_prefetch=0,
            grid=(B, outer, inner),
            in_specs=[_x_spec(c) for c in chans] + [
                pl.BlockSpec((1, tr, LANE),
                             lambda b, o, i, n_in=inner: (b, o * n_in + i, 0)),
            ],
            out_specs=pl.BlockSpec(
                (1, K * 3 * SUB, LANE),
                lambda b, o, i, n_out=outer: (b * n_out + o, 0, 0)),
        ),
        compiler_params=pltpu.CompilerParams(
            dimension_semantics=("parallel", "parallel", "arbitrary"),
            vmem_limit_bytes=32 * 1024 * 1024),
    )(*([x] * K + [lab]))

    # Cheap nonlinear finalize on (B, K, 3) partials in plain JAX.
    part = out.reshape(B, outer, K, 3, SUB, LANE).sum(axis=(1, 4, 5))
    inter = part[:, :, 0] + smooth
    union = part[:, :, 1] + part[:, :, 2] + smooth
    score = jnp.sum(2.0 * inter / union)
    return 1.0 - score / (float(B) * float(n_classes))


def _reference_loss(logits, target, class_ids, n_classes, smooth=0.01):
    """Pure-JAX reference mirroring the PyTorch forward."""
    B = logits.shape[0]
    cid = jnp.asarray(class_ids)
    p = jax.nn.softmax(logits[:, cid], axis=1).reshape(B, len(class_ids), -1)
    t_onehot = jax.nn.one_hot(target.reshape(B, -1), n_classes, axis=1)   # (B, nC, N)
    t = t_onehot[:, cid, :]
    inter = jnp.sum(p * t, axis=2) + smooth
    union = jnp.sum(p, axis=2) + jnp.sum(t, axis=2) + smooth
    score = jnp.sum(2.0 * inter / union)
    return 1.0 - score / (float(B) * float(n_classes))


if __name__ == "__main__":
    key = jax.random.PRNGKey(0)
    k1, k2, k3, k4 = jax.random.split(key, 4)

    # Case 1: ragged spatial extent (16x16 = 256 px) -> padded bf16/int8 path.
    B, C, H, W = 2, 4, 16, 16
    n_classes, class_ids = 4, (1, 2, 3)
    logits = jax.random.normal(k1, (B, C, H, W), dtype=jnp.float32)
    target = jax.random.randint(k2, (B, 1, H, W), 0, n_classes, dtype=jnp.int32)

    loss_fn = jax.jit(functools.partial(
        custom_soft_dice_loss, class_ids=class_ids, n_classes=n_classes))
    loss = jax.block_until_ready(loss_fn(logits, target))

    ref_f32 = _reference_loss(logits, target, class_ids, n_classes)
    ref_bf16 = _reference_loss(logits.astype(jnp.bfloat16).astype(jnp.float32),
                               target, class_ids, n_classes)
    assert jnp.allclose(loss, ref_bf16, atol=5e-4, rtol=5e-4), (loss, ref_bf16)
    assert jnp.allclose(loss, ref_f32, atol=5e-3, rtol=5e-3), (loss, ref_f32)

    # Case 2: aligned spatial extent (32x32 = 1024 px) -> zero-copy path reading the
    # raw f32 logits planes directly.
    B2, C2, H2, W2 = 2, 5, 32, 32
    n_classes2, class_ids2 = 5, (0, 2, 4)
    logits2 = jax.random.normal(k3, (B2, C2, H2, W2), dtype=jnp.float32)
    target2 = jax.random.randint(k4, (B2, 1, H2, W2), 0, n_classes2, dtype=jnp.int32)

    loss2_fn = jax.jit(functools.partial(
        custom_soft_dice_loss, class_ids=class_ids2, n_classes=n_classes2))
    loss2 = jax.block_until_ready(loss2_fn(logits2, target2))
    ref2 = _reference_loss(logits2, target2, class_ids2, n_classes2)
    assert jnp.allclose(loss2, ref2, atol=1e-4, rtol=1e-4), (loss2, ref2)

    print("KERNEL_OK")
</pallas_src>

<mosaic_0001>
module attributes {stable_mosaic.version = 11 : i64} {
  func.func @_dice_partial_kernel(%arg0: i32, %arg1: i32, %arg2: i32, %arg3: memref<1x1x32x128xbf16, #tpu.memory_space<vmem>>, %arg4: memref<1x1x32x128xbf16, #tpu.memory_space<vmem>>, %arg5: memref<1x1x32x128xbf16, #tpu.memory_space<vmem>>, %arg6: memref<1x32x128xi8, #tpu.memory_space<vmem>>, %arg7: memref<1x72x128xf32, #tpu.memory_space<vmem>>) attributes {dimension_semantics = [#tpu.dimension_semantics<parallel>, #tpu.dimension_semantics<parallel>, #tpu.dimension_semantics<arbitrary>], iteration_bounds = array<i64: 2, 1, 1>, scalar_prefetch = 0 : i64, scratch_operands = 0 : i64, tpu.core_type = #tpu.core_type<tc>, window_params = [{transform_indices = @transform_0, window_bounds = array<i64: 1, 1, 32, 128>}, {transform_indices = @transform_1, window_bounds = array<i64: 1, 1, 32, 128>}, {transform_indices = @transform_2, window_bounds = array<i64: 1, 1, 32, 128>}, {transform_indices = @transform_3, window_bounds = array<i64: 1, 32, 128>}, {transform_indices = @transform_4, window_bounds = array<i64: 1, 72, 128>}]} {
    %c0_i32 = arith.constant 0 : i32
    %0 = arith.cmpi eq, %arg2, %c0_i32 : i32
    %1 = arith.extui %0 : i1 to i32
    %c0_i32_0 = arith.constant 0 : i32
    %2 = arith.cmpi ne, %1, %c0_i32_0 : i32
    scf.if %2 {
      %cst_19 = arith.constant 0.000000e+00 : f32
      %38 = vector.broadcast %cst_19 : f32 to vector<1x72x128xf32>
      %c0_20 = arith.constant 0 : index
      %c0_21 = arith.constant 0 : index
      %c0_22 = arith.constant 0 : index
      %39 = vector.load %arg7[%c0_20, %c0_21, %c0_22] : memref<1x72x128xf32, #tpu.memory_space<vmem>>, vector<1x72x128xf32>
      tpu.vector_store %arg7[%c0_20, %c0_21, %c0_22], %38 {strides = array<i32>} : memref<1x72x128xf32, #tpu.memory_space<vmem>>, vector<1x72x128xf32>,
    } else {
    }
    %c0 = arith.constant 0 : index
    %c0_1 = arith.constant 0 : index
    %c0_2 = arith.constant 0 : index
    %3 = vector.load %arg6[%c0, %c0_1, %c0_2] : memref<1x32x128xi8, #tpu.memory_space<vmem>>, vector<1x32x128xi8>
    %4 = vector.shape_cast %3 : vector<1x32x128xi8> to vector<32x128xi8>
    %5 = arith.extsi %4 : vector<32x128xi8> to vector<32x128xi32>
    %c0_3 = arith.constant 0 : index
    %c0_4 = arith.constant 0 : index
    %c0_5 = arith.constant 0 : index
    %c0_6 = arith.constant 0 : index
    %6 = vector.load %arg3[%c0_3, %c0_4, %c0_5, %c0_6] : memref<1x1x32x128xbf16, #tpu.memory_space<vmem>>, vector<1x1x32x128xbf16>
    %7 = vector.shape_cast %6 : vector<1x1x32x128xbf16> to vector<32x128xbf16>
    %8 = arith.extf %7 : vector<32x128xbf16> to vector<32x128xf32>
    %c0_7 = arith.constant 0 : index
    %c0_8 = arith.constant 0 : index
    %c0_9 = arith.constant 0 : index
    %c0_10 = arith.constant 0 : index
    %9 = vector.load %arg4[%c0_7, %c0_8, %c0_9, %c0_10] : memref<1x1x32x128xbf16, #tpu.memory_space<vmem>>, vector<1x1x32x128xbf16>
    %10 = vector.shape_cast %9 : vector<1x1x32x128xbf16> to vector<32x128xbf16>
    %11 = arith.extf %10 : vector<32x128xbf16> to vector<32x128xf32>
    %c0_11 = arith.constant 0 : index
    %c0_12 = arith.constant 0 : index
    %c0_13 = arith.constant 0 : index
    %c0_14 = arith.constant 0 : index
    %12 = vector.load %arg5[%c0_11, %c0_12, %c0_13, %c0_14] : memref<1x1x32x128xbf16, #tpu.memory_space<vmem>>, vector<1x1x32x128xbf16>
    %13 = vector.shape_cast %12 : vector<1x1x32x128xbf16> to vector<32x128xbf16>
    %14 = arith.extf %13 : vector<32x128xbf16> to vector<32x128xf32>
    %15 = arith.maximumf %8, %11 : vector<32x128xf32>
    %16 = arith.maximumf %15, %14 : vector<32x128xf32>
    %17 = arith.subf %8, %16 : vector<32x128xf32>
    %18 = math.exp %17 : vector<32x128xf32>
    %19 = arith.subf %11, %16 : vector<32x128xf32>
    %20 = math.exp %19 : vector<32x128xf32>
    %21 = arith.subf %14, %16 : vector<32x128xf32>
    %22 = math.exp %21 : vector<32x128xf32>
    %23 = arith.addf %18, %20 : vector<32x128xf32>
    %24 = arith.addf %23, %22 : vector<32x128xf32>
    %25 = tpu.reciprocal %24 {approx = true} : vector<32x128xf32> -> vector<32x128xf32>
    %26 = arith.mulf %24, %25 : vector<32x128xf32>
    %cst = arith.constant 2.000000e+00 : f32
    %27 = vector.broadcast %cst : f32 to vector<32x128xf32>
    %28 = arith.subf %27, %26 : vector<32x128xf32>
    %29 = arith.mulf %25, %28 : vector<32x128xf32>
    %c1_i32 = arith.constant 1 : i32
    %30 = arith.muli %arg1, %c1_i32 : i32
    %31 = arith.addi %30, %arg2 : i32
    %c0_i32_15 = arith.constant 0 : i32
    %32 = arith.cmpi slt, %31, %c0_i32_15 : i32
    %33 = arith.extui %32 : i1 to i32
    %c0_i32_16 = arith.constant 0 : i32
    %34 = arith.cmpi ne, %33, %c0_i32_16 : i32
    scf.if %34 {
      %38 = arith.mulf %18, %29 : vector<32x128xf32>
      %c1_i32_19 = arith.constant 1 : i32
      %39 = vector.broadcast %c1_i32_19 : i32 to vector<32x128xi32>
      %40 = arith.cmpi eq, %5, %39 : vector<32x128xi32>
      %41 = arith.extui %40 : vector<32x128xi1> to vector<32x128xi32>
      %42 = arith.sitofp %41 : vector<32x128xi32> to vector<32x128xf32>
      %c0_20 = arith.constant 0 : index
      %c0_21 = arith.constant 0 : index
      %c0_22 = arith.constant 0 : index
      %43 = vector.load %arg7[%c0_20, %c0_21, %c0_22] : memref<1x72x128xf32, #tpu.memory_space<vmem>>, vector<1x8x128xf32>
      %44 = vector.shape_cast %43 : vector<1x8x128xf32> to vector<8x128xf32>
      %45 = arith.mulf %38, %42 : vector<32x128xf32>
      %46 = vector.extract_strided_slice %45 {offsets = [0, 0], sizes = [8, 128], strides = [1, 1]} : vector<32x128xf32> to vector<8x128xf32>
      %47 = vector.extract_strided_slice %45 {offsets = [8, 0], sizes = [8, 128], strides = [1, 1]} : vector<32x128xf32> to vector<8x128xf32>
      %48 = arith.addf %46, %47 : vector<8x128xf32>
      %49 = vector.extract_strided_slice %45 {offsets = [16, 0], sizes = [8, 128], strides = [1, 1]} : vector<32x128xf32> to vector<8x128xf32>
      %50 = arith.addf %48, %49 : vector<8x128xf32>
      %51 = vector.extract_strided_slice %45 {offsets = [24, 0], sizes = [8, 128], strides = [1, 1]} : vector<32x128xf32> to vector<8x128xf32>
      %52 = arith.addf %50, %51 : vector<8x128xf32>
      %53 = arith.addf %44, %52 : vector<8x128xf32>
      %c0_23 = arith.constant 0 : index
      %c0_24 = arith.constant 0 : index
      %c0_25 = arith.constant 0 : index
      %54 = vector.load %arg7[%c0_23, %c0_24, %c0_25] : memref<1x72x128xf32, #tpu.memory_space<vmem>>, vector<1x8x128xf32>
      %55 = vector.shape_cast %54 : vector<1x8x128xf32> to vector<8x128xf32>
      %56 = vector.shape_cast %53 : vector<8x128xf32> to vector<1x8x128xf32>
      tpu.vector_store %arg7[%c0_23, %c0_24, %c0_25], %56 {strides = array<i32>} : memref<1x72x128xf32, #tpu.memory_space<vmem>>, vector<1x8x128xf32>,
      %c0_26 = arith.constant 0 : index
      %c8 = arith.constant 8 : index
      %c0_27 = arith.constant 0 : index
      %57 = vector.load %arg7[%c0_26, %c8, %c0_27] : memref<1x72x128xf32, #tpu.memory_space<vmem>>, vector<1x8x128xf32>
      %58 = vector.shape_cast %57 : vector<1x8x128xf32> to vector<8x128xf32>
      %59 = vector.extract_strided_slice %38 {offsets = [0, 0], sizes = [8, 128], strides = [1, 1]} : vector<32x128xf32> to vector<8x128xf32>
      %60 = vector.extract_strided_slice %38 {offsets = [8, 0], sizes = [8, 128], strides = [1, 1]} : vector<32x128xf32> to vector<8x128xf32>
      %61 = arith.addf %59, %60 : vector<8x128xf32>
      %62 = vector.extract_strided_slice %38 {offsets = [16, 0], sizes = [8, 128], strides = [1, 1]} : vector<32x128xf32> to vector<8x128xf32>
      %63 = arith.addf %61, %62 : vector<8x128xf32>
      %64 = vector.extract_strided_slice %38 {offsets = [24, 0], sizes = [8, 128], strides = [1, 1]} : vector<32x128xf32> to vector<8x128xf32>
      %65 = arith.addf %63, %64 : vector<8x128xf32>
      %66 = arith.addf %58, %65 : vector<8x128xf32>
      %c0_28 = arith.constant 0 : index
      %c8_29 = arith.constant 8 : index
      %c0_30 = arith.constant 0 : index
      %67 = vector.load %arg7[%c0_28, %c8_29, %c0_30] : memref<1x72x128xf32, #tpu.memory_space<vmem>>, vector<1x8x128xf32>
      %68 = vector.shape_cast %67 : vector<1x8x128xf32> to vector<8x128xf32>
      %69 = vector.shape_cast %66 : vector<8x128xf32> to vector<1x8x128xf32>
      tpu.vector_store %arg7[%c0_28, %c8_29, %c0_30], %69 {strides = array<i32>} : memref<1x72x128xf32, #tpu.memory_space<vmem>>, vector<1x8x128xf32>,
      %c0_31 = arith.constant 0 : index
      %c16 = arith.constant 16 : index
      %c0_32 = arith.constant 0 : index
      %70 = vector.load %arg7[%c0_31, %c16, %c0_32] : memref<1x72x128xf32, #tpu.memory_space<vmem>>, vector<1x8x128xf32>
      %71 = vector.shape_cast %70 : vector<1x8x128xf32> to vector<8x128xf32>
      %72 = vector.extract_strided_slice %42 {offsets = [0, 0], sizes = [8, 128], strides = [1, 1]} : vector<32x128xf32> to vector<8x128xf32>
      %73 = vector.extract_strided_slice %42 {offsets = [8, 0], sizes = [8, 128], strides = [1, 1]} : vector<32x128xf32> to vector<8x128xf32>
      %74 = arith.addf %72, %73 : vector<8x128xf32>
      %75 = vector.extract_strided_slice %42 {offsets = [16, 0], sizes = [8, 128], strides = [1, 1]} : vector<32x128xf32> to vector<8x128xf32>
      %76 = arith.addf %74, %75 : vector<8x128xf32>
      %77 = vector.extract_strided_slice %42 {offsets = [24, 0], sizes = [8, 128], strides = [1, 1]} : vector<32x128xf32> to vector<8x128xf32>
      %78 = arith.addf %76, %77 : vector<8x128xf32>
      %79 = arith.addf %71, %78 : vector<8x128xf32>
      %c0_33 = arith.constant 0 : index
      %c16_34 = arith.constant 16 : index
      %c0_35 = arith.constant 0 : index
      %80 = vector.load %arg7[%c0_33, %c16_34, %c0_35] : memref<1x72x128xf32, #tpu.memory_space<vmem>>, vector<1x8x128xf32>
      %81 = vector.shape_cast %80 : vector<1x8x128xf32> to vector<8x128xf32>
      %82 = vector.shape_cast %79 : vector<8x128xf32> to vector<1x8x128xf32>
      tpu.vector_store %arg7[%c0_33, %c16_34, %c0_35], %82 {strides = array<i32>} : memref<1x72x128xf32, #tpu.memory_space<vmem>>, vector<1x8x128xf32>,
      %83 = arith.mulf %20, %29 : vector<32x128xf32>
      %c2_i32 = arith.constant 2 : i32
      %84 = vector.broadcast %c2_i32 : i32 to vector<32x128xi32>
      %85 = arith.cmpi eq, %5, %84 : vector<32x128xi32>
      %86 = arith.extui %85 : vector<32x128xi1> to vector<32x128xi32>
      %87 = arith.sitofp %86 : vector<32x128xi32> to vector<32x128xf32>
      %c0_36 = arith.constant 0 : index
      %c24 = arith.constant 24 : index
      %c0_37 = arith.constant 0 : index
      %88 = vector.load %arg7[%c0_36, %c24, %c0_37] : memref<1x72x128xf32, #tpu.memory_space<vmem>>, vector<1x8x128xf32>
      %89 = vector.shape_cast %88 : vector<1x8x128xf32> to vector<8x128xf32>
      %90 = arith.mulf %83, %87 : vector<32x128xf32>
      %91 = vector.extract_strided_slice %90 {offsets = [0, 0], sizes = [8, 128], strides = [1, 1]} : vector<32x128xf32> to vector<8x128xf32>
      %92 = vector.extract_strided_slice %90 {offsets = [8, 0], sizes = [8, 128], strides = [1, 1]} : vector<32x128xf32> to vector<8x128xf32>
      %93 = arith.addf %91, %92 : vector<8x128xf32>
      %94 = vector.extract_strided_slice %90 {offsets = [16, 0], sizes = [8, 128], strides = [1, 1]} : vector<32x128xf32> to vector<8x128xf32>
      %95 = arith.addf %93, %94 : vector<8x128xf32>
      %96 = vector.extract_strided_slice %90 {offsets = [24, 0], sizes = [8, 128], strides = [1, 1]} : vector<32x128xf32> to vector<8x128xf32>
      %97 = arith.addf %95, %96 : vector<8x128xf32>
      %98 = arith.addf %89, %97 : vector<8x128xf32>
      %c0_38 = arith.constant 0 : index
      %c24_39 = arith.constant 24 : index
      %c0_40 = arith.constant 0 : index
      %99 = vector.load %arg7[%c0_38, %c24_39, %c0_40] : memref<1x72x128xf32, #tpu.memory_space<vmem>>, vector<1x8x128xf32>
      %100 = vector.shape_cast %99 : vector<1x8x128xf32> to vector<8x128xf32>
      %101 = vector.shape_cast %98 : vector<8x128xf32> to vector<1x8x128xf32>
      tpu.vector_store %arg7[%c0_38, %c24_39, %c0_40], %101 {strides = array<i32>} : memref<1x72x128xf32, #tpu.memory_space<vmem>>, vector<1x8x128xf32>,
      %c0_41 = arith.constant 0 : index
      %c32 = arith.constant 32 : index
      %c0_42 = arith.constant 0 : index
      %102 = vector.load %arg7[%c0_41, %c32, %c0_42] : memref<1x72x128xf32, #tpu.memory_space<vmem>>, vector<1x8x128xf32>
      %103 = vector.shape_cast %102 : vector<1x8x128xf32> to vector<8x128xf32>
      %104 = vector.extract_strided_slice %83 {offsets = [0, 0], sizes = [8, 128], strides = [1, 1]} : vector<32x128xf32> to vector<8x128xf32>
      %105 = vector.extract_strided_slice %83 {offsets = [8, 0], sizes = [8, 128], strides = [1, 1]} : vector<32x128xf32> to vector<8x128xf32>
      %106 = arith.addf %104, %105 : vector<8x128xf32>
      %107 = vector.extract_strided_slice %83 {offsets = [16, 0], sizes = [8, 128], strides = [1, 1]} : vector<32x128xf32> to vector<8x128xf32>
      %108 = arith.addf %106, %107 : vector<8x128xf32>
      %109 = vector.extract_strided_slice %83 {offsets = [24, 0], sizes = [8, 128], strides = [1, 1]} : vector<32x128xf32> to vector<8x128xf32>
      %110 = arith.addf %108, %109 : vector<8x128xf32>
      %111 = arith.addf %103, %110 : vector<8x128xf32>
      %c0_43 = arith.constant 0 : index
      %c32_44 = arith.constant 32 : index
      %c0_45 = arith.constant 0 : index
      %112 = vector.load %arg7[%c0_43, %c32_44, %c0_45] : memref<1x72x128xf32, #tpu.memory_space<vmem>>, vector<1x8x128xf32>
      %113 = vector.shape_cast %112 : vector<1x8x128xf32> to vector<8x128xf32>
      %114 = vector.shape_cast %111 : vector<8x128xf32> to vector<1x8x128xf32>
      tpu.vector_store %arg7[%c0_43, %c32_44, %c0_45], %114 {strides = array<i32>} : memref<1x72x128xf32, #tpu.memory_space<vmem>>, vector<1x8x128xf32>,
      %c0_46 = arith.constant 0 : index
      %c40 = arith.constant 40 : index
      %c0_47 = arith.constant 0 : index
      %115 = vector.load %arg7[%c0_46, %c40, %c0_47] : memref<1x72x128xf32, #tpu.memory_space<vmem>>, vector<1x8x128xf32>
      %116 = vector.shape_cast %115 : vector<1x8x128xf32> to vector<8x128xf32>
      %117 = vector.extract_strided_slice %87 {offsets = [0, 0], sizes = [8, 128], strides = [1, 1]} : vector<32x128xf32> to vector<8x128xf32>
      %118 = vector.extract_strided_slice %87 {offsets = [8, 0], sizes = [8, 128], strides = [1, 1]} : vector<32x128xf32> to vector<8x128xf32>
      %119 = arith.addf %117, %118 : vector<8x128xf32>
      %120 = vector.extract_strided_slice %87 {offsets = [16, 0], sizes = [8, 128], strides = [1, 1]} : vector<32x128xf32> to vector<8x128xf32>
      %121 = arith.addf %119, %120 : vector<8x128xf32>
      %122 = vector.extract_strided_slice %87 {offsets = [24, 0], sizes = [8, 128], strides = [1, 1]} : vector<32x128xf32> to vector<8x128xf32>
      %123 = arith.addf %121, %122 : vector<8x128xf32>
      %124 = arith.addf %116, %123 : vector<8x128xf32>
      %c0_48 = arith.constant 0 : index
      %c40_49 = arith.constant 40 : index
      %c0_50 = arith.constant 0 : index
      %125 = vector.load %arg7[%c0_48, %c40_49, %c0_50] : memref<1x72x128xf32, #tpu.memory_space<vmem>>, vector<1x8x128xf32>
      %126 = vector.shape_cast %125 : vector<1x8x128xf32> to vector<8x128xf32>
      %127 = vector.shape_cast %124 : vector<8x128xf32> to vector<1x8x128xf32>
      tpu.vector_store %arg7[%c0_48, %c40_49, %c0_50], %127 {strides = array<i32>} : memref<1x72x128xf32, #tpu.memory_space<vmem>>, vector<1x8x128xf32>,
      %128 = arith.mulf %22, %29 : vector<32x128xf32>
      %c3_i32 = arith.constant 3 : i32
      %129 = vector.broadcast %c3_i32 : i32 to vector<32x128xi32>
      %130 = arith.cmpi eq, %5, %129 : vector<32x128xi32>
      %131 = arith.extui %130 : vector<32x128xi1> to vector<32x128xi32>
      %132 = arith.sitofp %131 : vector<32x128xi32> to vector<32x128xf32>
      %c0_51 = arith.constant 0 : index
      %c48 = arith.constant 48 : index
      %c0_52 = arith.constant 0 : index
      %133 = vector.load %arg7[%c0_51, %c48, %c0_52] : memref<1x72x128xf32, #tpu.memory_space<vmem>>, vector<1x8x128xf32>
      %134 = vector.shape_cast %133 : vector<1x8x128xf32> to vector<8x128xf32>
      %135 = arith.mulf %128, %132 : vector<32x128xf32>
      %136 = vector.extract_strided_slice %135 {offsets = [0, 0], sizes = [8, 128], strides = [1, 1]} : vector<32x128xf32> to vector<8x128xf32>
      %137 = vector.extract_strided_slice %135 {offsets = [8, 0], sizes = [8, 128], strides = [1, 1]} : vector<32x128xf32> to vector<8x128xf32>
      %138 = arith.addf %136, %137 : vector<8x128xf32>
      %139 = vector.extract_strided_slice %135 {offsets = [16, 0], sizes = [8, 128], strides = [1, 1]} : vector<32x128xf32> to vector<8x128xf32>
      %140 = arith.addf %138, %139 : vector<8x128xf32>
      %141 = vector.extract_strided_slice %135 {offsets = [24, 0], sizes = [8, 128], strides = [1, 1]} : vector<32x128xf32> to vector<8x128xf32>
      %142 = arith.addf %140, %141 : vector<8x128xf32>
      %143 = arith.addf %134, %142 : vector<8x128xf32>
      %c0_53 = arith.constant 0 : index
      %c48_54 = arith.constant 48 : index
      %c0_55 = arith.constant 0 : index
      %144 = vector.load %arg7[%c0_53, %c48_54, %c0_55] : memref<1x72x128xf32, #tpu.memory_space<vmem>>, vector<1x8x128xf32>
      %145 = vector.shape_cast %144 : vector<1x8x128xf32> to vector<8x128xf32>
      %146 = vector.shape_cast %143 : vector<8x128xf32> to vector<1x8x128xf32>
      tpu.vector_store %arg7[%c0_53, %c48_54, %c0_55], %146 {strides = array<i32>} : memref<1x72x128xf32, #tpu.memory_space<vmem>>, vector<1x8x128xf32>,
      %c0_56 = arith.constant 0 : index
      %c56 = arith.constant 56 : index
      %c0_57 = arith.constant 0 : index
      %147 = vector.load %arg7[%c0_56, %c56, %c0_57] : memref<1x72x128xf32, #tpu.memory_space<vmem>>, vector<1x8x128xf32>
      %148 = vector.shape_cast %147 : vector<1x8x128xf32> to vector<8x128xf32>
      %149 = vector.extract_strided_slice %128 {offsets = [0, 0], sizes = [8, 128], strides = [1, 1]} : vector<32x128xf32> to vector<8x128xf32>
      %150 = vector.extract_strided_slice %128 {offsets = [8, 0], sizes = [8, 128], strides = [1, 1]} : vector<32x128xf32> to vector<8x128xf32>
      %151 = arith.addf %149, %150 : vector<8x128xf32>
      %152 = vector.extract_strided_slice %128 {offsets = [16, 0], sizes = [8, 128], strides = [1, 1]} : vector<32x128xf32> to vector<8x128xf32>
      %153 = arith.addf %151, %152 : vector<8x128xf32>
      %154 = vector.extract_strided_slice %128 {offsets = [24, 0], sizes = [8, 128], strides = [1, 1]} : vector<32x128xf32> to vector<8x128xf32>
      %155 = arith.addf %153, %154 : vector<8x128xf32>
      %156 = arith.addf %148, %155 : vector<8x128xf32>
      %c0_58 = arith.constant 0 : index
      %c56_59 = arith.constant 56 : index
      %c0_60 = arith.constant 0 : index
      %157 = vector.load %arg7[%c0_58, %c56_59, %c0_60] : memref<1x72x128xf32, #tpu.memory_space<vmem>>, vector<1x8x128xf32>
      %158 = vector.shape_cast %157 : vector<1x8x128xf32> to vector<8x128xf32>
      %159 = vector.shape_cast %156 : vector<8x128xf32> to vector<1x8x128xf32>
      tpu.vector_store %arg7[%c0_58, %c56_59, %c0_60], %159 {strides = array<i32>} : memref<1x72x128xf32, #tpu.memory_space<vmem>>, vector<1x8x128xf32>,
      %c0_61 = arith.constant 0 : index
      %c64 = arith.constant 64 : index
      %c0_62 = arith.constant 0 : index
      %160 = vector.load %arg7[%c0_61, %c64, %c0_62] : memref<1x72x128xf32, #tpu.memory_space<vmem>>, vector<1x8x128xf32>
      %161 = vector.shape_cast %160 : vector<1x8x128xf32> to vector<8x128xf32>
      %162 = vector.extract_strided_slice %132 {offsets = [0, 0], sizes = [8, 128], strides = [1, 1]} : vector<32x128xf32> to vector<8x128xf32>
      %163 = vector.extract_strided_slice %132 {offsets = [8, 0], sizes = [8, 128], strides = [1, 1]} : vector<32x128xf32> to vector<8x128xf32>
      %164 = arith.addf %162, %163 : vector<8x128xf32>
      %165 = vector.extract_strided_slice %132 {offsets = [16, 0], sizes = [8, 128], strides = [1, 1]} : vector<32x128xf32> to vector<8x128xf32>
      %166 = arith.addf %164, %165 : vector<8x128xf32>
      %167 = vector.extract_strided_slice %132 {offsets = [24, 0], sizes = [8, 128], strides = [1, 1]} : vector<32x128xf32> to vector<8x128xf32>
      %168 = arith.addf %166, %167 : vector<8x128xf32>
      %169 = arith.addf %161, %168 : vector<8x128xf32>
      %c0_63 = arith.constant 0 : index
      %c64_64 = arith.constant 64 : index
      %c0_65 = arith.constant 0 : index
      %170 = vector.load %arg7[%c0_63, %c64_64, %c0_65] : memref<1x72x128xf32, #tpu.memory_space<vmem>>, vector<1x8x128xf32>
      %171 = vector.shape_cast %170 : vector<1x8x128xf32> to vector<8x128xf32>
      %172 = vector.shape_cast %169 : vector<8x128xf32> to vector<1x8x128xf32>
      tpu.vector_store %arg7[%c0_63, %c64_64, %c0_65], %172 {strides = array<i32>} : memref<1x72x128xf32, #tpu.memory_space<vmem>>, vector<1x8x128xf32>,
    } else {
    }
    %c0_i32_17 = arith.constant 0 : i32
    %35 = arith.cmpi sge, %31, %c0_i32_17 : i32
    %36 = arith.extui %35 : i1 to i32
    %c0_i32_18 = arith.constant 0 : i32
    %37 = arith.cmpi ne, %36, %c0_i32_18 : i32
    scf.if %37 {
      %c0_i32_19 = arith.constant 0 : i32
      %38 = vector.broadcast %c0_i32_19 : i32 to vector<32x128xi32>
      %39 = arith.cmpi sge, %5, %38 : vector<32x128xi32>
      %40 = arith.extui %39 : vector<32x128xi1> to vector<32x128xi32>
      %41 = arith.sitofp %40 : vector<32x128xi32> to vector<32x128xf32>
      %42 = arith.mulf %29, %41 : vector<32x128xf32>
      %43 = arith.mulf %18, %42 : vector<32x128xf32>
      %c1_i32_20 = arith.constant 1 : i32
      %44 = vector.broadcast %c1_i32_20 : i32 to vector<32x128xi32>
      %45 = arith.cmpi eq, %5, %44 : vector<32x128xi32>
      %46 = arith.extui %45 : vector<32x128xi1> to vector<32x128xi32>
      %47 = arith.sitofp %46 : vector<32x128xi32> to vector<32x128xf32>
      %c0_21 = arith.constant 0 : index
      %c0_22 = arith.constant 0 : index
      %c0_23 = arith.constant 0 : index
      %48 = vector.load %arg7[%c0_21, %c0_22, %c0_23] : memref<1x72x128xf32, #tpu.memory_space<vmem>>, vector<1x8x128xf32>
      %49 = vector.shape_cast %48 : vector<1x8x128xf32> to vector<8x128xf32>
      %50 = arith.mulf %43, %47 : vector<32x128xf32>
      %51 = vector.extract_strided_slice %50 {offsets = [0, 0], sizes = [8, 128], strides = [1, 1]} : vector<32x128xf32> to vector<8x128xf32>
      %52 = vector.extract_strided_slice %50 {offsets = [8, 0], sizes = [8, 128], strides = [1, 1]} : vector<32x128xf32> to vector<8x128xf32>
      %53 = arith.addf %51, %52 : vector<8x128xf32>
      %54 = vector.extract_strided_slice %50 {offsets = [16, 0], sizes = [8, 128], strides = [1, 1]} : vector<32x128xf32> to vector<8x128xf32>
      %55 = arith.addf %53, %54 : vector<8x128xf32>
      %56 = vector.extract_strided_slice %50 {offsets = [24, 0], sizes = [8, 128], strides = [1, 1]} : vector<32x128xf32> to vector<8x128xf32>
      %57 = arith.addf %55, %56 : vector<8x128xf32>
      %58 = arith.addf %49, %57 : vector<8x128xf32>
      %c0_24 = arith.constant 0 : index
      %c0_25 = arith.constant 0 : index
      %c0_26 = arith.constant 0 : index
      %59 = vector.load %arg7[%c0_24, %c0_25, %c0_26] : memref<1x72x128xf32, #tpu.memory_space<vmem>>, vector<1x8x128xf32>
      %60 = vector.shape_cast %59 : vector<1x8x128xf32> to vector<8x128xf32>
      %61 = vector.shape_cast %58 : vector<8x128xf32> to vector<1x8x128xf32>
      tpu.vector_store %arg7[%c0_24, %c0_25, %c0_26], %61 {strides = array<i32>} : memref<1x72x128xf32, #tpu.memory_space<vmem>>, vector<1x8x128xf32>,
      %c0_27 = arith.constant 0 : index
      %c8 = arith.constant 8 : index
      %c0_28 = arith.constant 0 : index
      %62 = vector.load %arg7[%c0_27, %c8, %c0_28] : memref<1x72x128xf32, #tpu.memory_space<vmem>>, vector<1x8x128xf32>
      %63 = vector.shape_cast %62 : vector<1x8x128xf32> to vector<8x128xf32>
      %64 = vector.extract_strided_slice %43 {offsets = [0, 0], sizes = [8, 128], strides = [1, 1]} : vector<32x128xf32> to vector<8x128xf32>
      %65 = vector.extract_strided_slice %43 {offsets = [8, 0], sizes = [8, 128], strides = [1, 1]} : vector<32x128xf32> to vector<8x128xf32>
      %66 = arith.addf %64, %65 : vector<8x128xf32>
      %67 = vector.extract_strided_slice %43 {offsets = [16, 0], sizes = [8, 128], strides = [1, 1]} : vector<32x128xf32> to vector<8x128xf32>
      %68 = arith.addf %66, %67 : vector<8x128xf32>
      %69 = vector.extract_strided_slice %43 {offsets = [24, 0], sizes = [8, 128], strides = [1, 1]} : vector<32x128xf32> to vector<8x128xf32>
      %70 = arith.addf %68, %69 : vector<8x128xf32>
      %71 = arith.addf %63, %70 : vector<8x128xf32>
      %c0_29 = arith.constant 0 : index
      %c8_30 = arith.constant 8 : index
      %c0_31 = arith.constant 0 : index
      %72 = vector.load %arg7[%c0_29, %c8_30, %c0_31] : memref<1x72x128xf32, #tpu.memory_space<vmem>>, vector<1x8x128xf32>
      %73 = vector.shape_cast %72 : vector<1x8x128xf32> to vector<8x128xf32>
      %74 = vector.shape_cast %71 : vector<8x128xf32> to vector<1x8x128xf32>
      tpu.vector_store %arg7[%c0_29, %c8_30, %c0_31], %74 {strides = array<i32>} : memref<1x72x128xf32, #tpu.memory_space<vmem>>, vector<1x8x128xf32>,
      %c0_32 = arith.constant 0 : index
      %c16 = arith.constant 16 : index
      %c0_33 = arith.constant 0 : index
      %75 = vector.load %arg7[%c0_32, %c16, %c0_33] : memref<1x72x128xf32, #tpu.memory_space<vmem>>, vector<1x8x128xf32>
      %76 = vector.shape_cast %75 : vector<1x8x128xf32> to vector<8x128xf32>
      %77 = vector.extract_strided_slice %47 {offsets = [0, 0], sizes = [8, 128], strides = [1, 1]} : vector<32x128xf32> to vector<8x128xf32>
      %78 = vector.extract_strided_slice %47 {offsets = [8, 0], sizes = [8, 128], strides = [1, 1]} : vector<32x128xf32> to vector<8x128xf32>
      %79 = arith.addf %77, %78 : vector<8x128xf32>
      %80 = vector.extract_strided_slice %47 {offsets = [16, 0], sizes = [8, 128], strides = [1, 1]} : vector<32x128xf32> to vector<8x128xf32>
      %81 = arith.addf %79, %80 : vector<8x128xf32>
      %82 = vector.extract_strided_slice %47 {offsets = [24, 0], sizes = [8, 128], strides = [1, 1]} : vector<32x128xf32> to vector<8x128xf32>
      %83 = arith.addf %81, %82 : vector<8x128xf32>
      %84 = arith.addf %76, %83 : vector<8x128xf32>
      %c0_34 = arith.constant 0 : index
      %c16_35 = arith.constant 16 : index
      %c0_36 = arith.constant 0 : index
      %85 = vector.load %arg7[%c0_34, %c16_35, %c0_36] : memref<1x72x128xf32, #tpu.memory_space<vmem>>, vector<1x8x128xf32>
      %86 = vector.shape_cast %85 : vector<1x8x128xf32> to vector<8x128xf32>
      %87 = vector.shape_cast %84 : vector<8x128xf32> to vector<1x8x128xf32>
      tpu.vector_store %arg7[%c0_34, %c16_35, %c0_36], %87 {strides = array<i32>} : memref<1x72x128xf32, #tpu.memory_space<vmem>>, vector<1x8x128xf32>,
      %88 = arith.mulf %20, %42 : vector<32x128xf32>
      %c2_i32 = arith.constant 2 : i32
      %89 = vector.broadcast %c2_i32 : i32 to vector<32x128xi32>
      %90 = arith.cmpi eq, %5, %89 : vector<32x128xi32>
      %91 = arith.extui %90 : vector<32x128xi1> to vector<32x128xi32>
      %92 = arith.sitofp %91 : vector<32x128xi32> to vector<32x128xf32>
      %c0_37 = arith.constant 0 : index
      %c24 = arith.constant 24 : index
      %c0_38 = arith.constant 0 : index
      %93 = vector.load %arg7[%c0_37, %c24, %c0_38] : memref<1x72x128xf32, #tpu.memory_space<vmem>>, vector<1x8x128xf32>
      %94 = vector.shape_cast %93 : vector<1x8x128xf32> to vector<8x128xf32>
      %95 = arith.mulf %88, %92 : vector<32x128xf32>
      %96 = vector.extract_strided_slice %95 {offsets = [0, 0], sizes = [8, 128], strides = [1, 1]} : vector<32x128xf32> to vector<8x128xf32>
      %97 = vector.extract_strided_slice %95 {offsets = [8, 0], sizes = [8, 128], strides = [1, 1]} : vector<32x128xf32> to vector<8x128xf32>
      %98 = arith.addf %96, %97 : vector<8x128xf32>
      %99 = vector.extract_strided_slice %95 {offsets = [16, 0], sizes = [8, 128], strides = [1, 1]} : vector<32x128xf32> to vector<8x128xf32>
      %100 = arith.addf %98, %99 : vector<8x128xf32>
      %101 = vector.extract_strided_slice %95 {offsets = [24, 0], sizes = [8, 128], strides = [1, 1]} : vector<32x128xf32> to vector<8x128xf32>
      %102 = arith.addf %100, %101 : vector<8x128xf32>
      %103 = arith.addf %94, %102 : vector<8x128xf32>
      %c0_39 = arith.constant 0 : index
      %c24_40 = arith.constant 24 : index
      %c0_41 = arith.constant 0 : index
      %104 = vector.load %arg7[%c0_39, %c24_40, %c0_41] : memref<1x72x128xf32, #tpu.memory_space<vmem>>, vector<1x8x128xf32>
      %105 = vector.shape_cast %104 : vector<1x8x128xf32> to vector<8x128xf32>
      %106 = vector.shape_cast %103 : vector<8x128xf32> to vector<1x8x128xf32>
      tpu.vector_store %arg7[%c0_39, %c24_40, %c0_41], %106 {strides = array<i32>} : memref<1x72x128xf32, #tpu.memory_space<vmem>>, vector<1x8x128xf32>,
      %c0_42 = arith.constant 0 : index
      %c32 = arith.constant 32 : index
      %c0_43 = arith.constant 0 : index
      %107 = vector.load %arg7[%c0_42, %c32, %c0_43] : memref<1x72x128xf32, #tpu.memory_space<vmem>>, vector<1x8x128xf32>
      %108 = vector.shape_cast %107 : vector<1x8x128xf32> to vector<8x128xf32>
      %109 = vector.extract_strided_slice %88 {offsets = [0, 0], sizes = [8, 128], strides = [1, 1]} : vector<32x128xf32> to vector<8x128xf32>
      %110 = vector.extract_strided_slice %88 {offsets = [8, 0], sizes = [8, 128], strides = [1, 1]} : vector<32x128xf32> to vector<8x128xf32>
      %111 = arith.addf %109, %110 : vector<8x128xf32>
      %112 = vector.extract_strided_slice %88 {offsets = [16, 0], sizes = [8, 128], strides = [1, 1]} : vector<32x128xf32> to vector<8x128xf32>
      %113 = arith.addf %111, %112 : vector<8x128xf32>
      %114 = vector.extract_strided_slice %88 {offsets = [24, 0], sizes = [8, 128], strides = [1, 1]} : vector<32x128xf32> to vector<8x128xf32>
      %115 = arith.addf %113, %114 : vector<8x128xf32>
      %116 = arith.addf %108, %115 : vector<8x128xf32>
      %c0_44 = arith.constant 0 : index
      %c32_45 = arith.constant 32 : index
      %c0_46 = arith.constant 0 : index
      %117 = vector.load %arg7[%c0_44, %c32_45, %c0_46] : memref<1x72x128xf32, #tpu.memory_space<vmem>>, vector<1x8x128xf32>
      %118 = vector.shape_cast %117 : vector<1x8x128xf32> to vector<8x128xf32>
      %119 = vector.shape_cast %116 : vector<8x128xf32> to vector<1x8x128xf32>
      tpu.vector_store %arg7[%c0_44, %c32_45, %c0_46], %119 {strides = array<i32>} : memref<1x72x128xf32, #tpu.memory_space<vmem>>, vector<1x8x128xf32>,
      %c0_47 = arith.constant 0 : index
      %c40 = arith.constant 40 : index
      %c0_48 = arith.constant 0 : index
      %120 = vector.load %arg7[%c0_47, %c40, %c0_48] : memref<1x72x128xf32, #tpu.memory_space<vmem>>, vector<1x8x128xf32>
      %121 = vector.shape_cast %120 : vector<1x8x128xf32> to vector<8x128xf32>
      %122 = vector.extract_strided_slice %92 {offsets = [0, 0], sizes = [8, 128], strides = [1, 1]} : vector<32x128xf32> to vector<8x128xf32>
      %123 = vector.extract_strided_slice %92 {offsets = [8, 0], sizes = [8, 128], strides = [1, 1]} : vector<32x128xf32> to vector<8x128xf32>
      %124 = arith.addf %122, %123 : vector<8x128xf32>
      %125 = vector.extract_strided_slice %92 {offsets = [16, 0], sizes = [8, 128], strides = [1, 1]} : vector<32x128xf32> to vector<8x128xf32>
      %126 = arith.addf %124, %125 : vector<8x128xf32>
      %127 = vector.extract_strided_slice %92 {offsets = [24, 0], sizes = [8, 128], strides = [1, 1]} : vector<32x128xf32> to vector<8x128xf32>
      %128 = arith.addf %126, %127 : vector<8x128xf32>
      %129 = arith.addf %121, %128 : vector<8x128xf32>
      %c0_49 = arith.constant 0 : index
      %c40_50 = arith.constant 40 : index
      %c0_51 = arith.constant 0 : index
      %130 = vector.load %arg7[%c0_49, %c40_50, %c0_51] : memref<1x72x128xf32, #tpu.memory_space<vmem>>, vector<1x8x128xf32>
      %131 = vector.shape_cast %130 : vector<1x8x128xf32> to vector<8x128xf32>
      %132 = vector.shape_cast %129 : vector<8x128xf32> to vector<1x8x128xf32>
      tpu.vector_store %arg7[%c0_49, %c40_50, %c0_51], %132 {strides = array<i32>} : memref<1x72x128xf32, #tpu.memory_space<vmem>>, vector<1x8x128xf32>,
      %133 = arith.mulf %22, %42 : vector<32x128xf32>
      %c3_i32 = arith.constant 3 : i32
      %134 = vector.broadcast %c3_i32 : i32 to vector<32x128xi32>
      %135 = arith.cmpi eq, %5, %134 : vector<32x128xi32>
      %136 = arith.extui %135 : vector<32x128xi1> to vector<32x128xi32>
      %137 = arith.sitofp %136 : vector<32x128xi32> to vector<32x128xf32>
      %c0_52 = arith.constant 0 : index
      %c48 = arith.constant 48 : index
      %c0_53 = arith.constant 0 : index
      %138 = vector.load %arg7[%c0_52, %c48, %c0_53] : memref<1x72x128xf32, #tpu.memory_space<vmem>>, vector<1x8x128xf32>
      %139 = vector.shape_cast %138 : vector<1x8x128xf32> to vector<8x128xf32>
      %140 = arith.mulf %133, %137 : vector<32x128xf32>
      %141 = vector.extract_strided_slice %140 {offsets = [0, 0], sizes = [8, 128], strides = [1, 1]} : vector<32x128xf32> to vector<8x128xf32>
      %142 = vector.extract_strided_slice %140 {offsets = [8, 0], sizes = [8, 128], strides = [1, 1]} : vector<32x128xf32> to vector<8x128xf32>
      %143 = arith.addf %141, %142 : vector<8x128xf32>
      %144 = vector.extract_strided_slice %140 {offsets = [16, 0], sizes = [8, 128], strides = [1, 1]} : vector<32x128xf32> to vector<8x128xf32>
      %145 = arith.addf %143, %144 : vector<8x128xf32>
      %146 = vector.extract_strided_slice %140 {offsets = [24, 0], sizes = [8, 128], strides = [1, 1]} : vector<32x128xf32> to vector<8x128xf32>
      %147 = arith.addf %145, %146 : vector<8x128xf32>
      %148 = arith.addf %139, %147 : vector<8x128xf32>
      %c0_54 = arith.constant 0 : index
      %c48_55 = arith.constant 48 : index
      %c0_56 = arith.constant 0 : index
      %149 = vector.load %arg7[%c0_54, %c48_55, %c0_56] : memref<1x72x128xf32, #tpu.memory_space<vmem>>, vector<1x8x128xf32>
      %150 = vector.shape_cast %149 : vector<1x8x128xf32> to vector<8x128xf32>
      %151 = vector.shape_cast %148 : vector<8x128xf32> to vector<1x8x128xf32>
      tpu.vector_store %arg7[%c0_54, %c48_55, %c0_56], %151 {strides = array<i32>} : memref<1x72x128xf32, #tpu.memory_space<vmem>>, vector<1x8x128xf32>,
      %c0_57 = arith.constant 0 : index
      %c56 = arith.constant 56 : index
      %c0_58 = arith.constant 0 : index
      %152 = vector.load %arg7[%c0_57, %c56, %c0_58] : memref<1x72x128xf32, #tpu.memory_space<vmem>>, vector<1x8x128xf32>
      %153 = vector.shape_cast %152 : vector<1x8x128xf32> to vector<8x128xf32>
      %154 = vector.extract_strided_slice %133 {offsets = [0, 0], sizes = [8, 128], strides = [1, 1]} : vector<32x128xf32> to vector<8x128xf32>
      %155 = vector.extract_strided_slice %133 {offsets = [8, 0], sizes = [8, 128], strides = [1, 1]} : vector<32x128xf32> to vector<8x128xf32>
      %156 = arith.addf %154, %155 : vector<8x128xf32>
      %157 = vector.extract_strided_slice %133 {offsets = [16, 0], sizes = [8, 128], strides = [1, 1]} : vector<32x128xf32> to vector<8x128xf32>
      %158 = arith.addf %156, %157 : vector<8x128xf32>
      %159 = vector.extract_strided_slice %133 {offsets = [24, 0], sizes = [8, 128], strides = [1, 1]} : vector<32x128xf32> to vector<8x128xf32>
      %160 = arith.addf %158, %159 : vector<8x128xf32>
      %161 = arith.addf %153, %160 : vector<8x128xf32>
      %c0_59 = arith.constant 0 : index
      %c56_60 = arith.constant 56 : index
      %c0_61 = arith.constant 0 : index
      %162 = vector.load %arg7[%c0_59, %c56_60, %c0_61] : memref<1x72x128xf32, #tpu.memory_space<vmem>>, vector<1x8x128xf32>
      %163 = vector.shape_cast %162 : vector<1x8x128xf32> to vector<8x128xf32>
      %164 = vector.shape_cast %161 : vector<8x128xf32> to vector<1x8x128xf32>
      tpu.vector_store %arg7[%c0_59, %c56_60, %c0_61], %164 {strides = array<i32>} : memref<1x72x128xf32, #tpu.memory_space<vmem>>, vector<1x8x128xf32>,
      %c0_62 = arith.constant 0 : index
      %c64 = arith.constant 64 : index
      %c0_63 = arith.constant 0 : index
      %165 = vector.load %arg7[%c0_62, %c64, %c0_63] : memref<1x72x128xf32, #tpu.memory_space<vmem>>, vector<1x8x128xf32>
      %166 = vector.shape_cast %165 : vector<1x8x128xf32> to vector<8x128xf32>
      %167 = vector.extract_strided_slice %137 {offsets = [0, 0], sizes = [8, 128], strides = [1, 1]} : vector<32x128xf32> to vector<8x128xf32>
      %168 = vector.extract_strided_slice %137 {offsets = [8, 0], sizes = [8, 128], strides = [1, 1]} : vector<32x128xf32> to vector<8x128xf32>
      %169 = arith.addf %167, %168 : vector<8x128xf32>
      %170 = vector.extract_strided_slice %137 {offsets = [16, 0], sizes = [8, 128], strides = [1, 1]} : vector<32x128xf32> to vector<8x128xf32>
      %171 = arith.addf %169, %170 : vector<8x128xf32>
      %172 = vector.extract_strided_slice %137 {offsets = [24, 0], sizes = [8, 128], strides = [1, 1]} : vector<32x128xf32> to vector<8x128xf32>
      %173 = arith.addf %171, %172 : vector<8x128xf32>
      %174 = arith.addf %166, %173 : vector<8x128xf32>
      %c0_64 = arith.constant 0 : index
      %c64_65 = arith.constant 64 : index
      %c0_66 = arith.constant 0 : index
      %175 = vector.load %arg7[%c0_64, %c64_65, %c0_66] : memref<1x72x128xf32, #tpu.memory_space<vmem>>, vector<1x8x128xf32>
      %176 = vector.shape_cast %175 : vector<1x8x128xf32> to vector<8x128xf32>
      %177 = vector.shape_cast %174 : vector<8x128xf32> to vector<1x8x128xf32>
      tpu.vector_store %arg7[%c0_64, %c64_65, %c0_66], %177 {strides = array<i32>} : memref<1x72x128xf32, #tpu.memory_space<vmem>>, vector<1x8x128xf32>,
    } else {
    }
    return
  }
  func.func @transform_0(%arg0: i32, %arg1: i32, %arg2: i32) -> (i32, i32, i32, i32) {
    %c1_i32 = arith.constant 1 : i32
    %0 = arith.muli %arg1, %c1_i32 : i32
    %1 = arith.addi %0, %arg2 : i32
    %c0_i32 = arith.constant 0 : i32
    %c0_i32_0 = arith.constant 0 : i32
    %c0_i32_1 = arith.constant 0 : i32
    return %arg0, %c0_i32, %1, %c0_i32_0 : i32, i32, i32, i32
  }
  func.func @transform_1(%arg0: i32, %arg1: i32, %arg2: i32) -> (i32, i32, i32, i32) {
    %c1_i32 = arith.constant 1 : i32
    %0 = arith.muli %arg1, %c1_i32 : i32
    %1 = arith.addi %0, %arg2 : i32
    %c1_i32_0 = arith.constant 1 : i32
    %c0_i32 = arith.constant 0 : i32
    %c0_i32_1 = arith.constant 0 : i32
    return %arg0, %c1_i32_0, %1, %c0_i32 : i32, i32, i32, i32
  }
  func.func @transform_2(%arg0: i32, %arg1: i32, %arg2: i32) -> (i32, i32, i32, i32) {
    %c1_i32 = arith.constant 1 : i32
    %0 = arith.muli %arg1, %c1_i32 : i32
    %1 = arith.addi %0, %arg2 : i32
    %c2_i32 = arith.constant 2 : i32
    %c0_i32 = arith.constant 0 : i32
    %c0_i32_0 = arith.constant 0 : i32
    return %arg0, %c2_i32, %1, %c0_i32 : i32, i32, i32, i32
  }
  func.func @transform_3(%arg0: i32, %arg1: i32, %arg2: i32) -> (i32, i32, i32) {
    %c1_i32 = arith.constant 1 : i32
    %0 = arith.muli %arg1, %c1_i32 : i32
    %1 = arith.addi %0, %arg2 : i32
    %c0_i32 = arith.constant 0 : i32
    %c0_i32_0 = arith.constant 0 : i32
    return %arg0, %1, %c0_i32 : i32, i32, i32
  }
  func.func @transform_4(%arg0: i32, %arg1: i32, %arg2: i32) -> (i32, i32, i32) {
    %c1_i32 = arith.constant 1 : i32
    %0 = arith.muli %arg0, %c1_i32 : i32
    %1 = arith.addi %0, %arg1 : i32
    %c0_i32 = arith.constant 0 : i32
    %c0_i32_0 = arith.constant 0 : i32
    %c0_i32_1 = arith.constant 0 : i32
    return %1, %c0_i32, %c0_i32_0 : i32, i32, i32
  }
}

</mosaic_0001>

<bundles_post_ra>
// kernel: custom_soft_dice_loss.1
= control target key start
LH: loop header
LB: loop body
LE: loop exit
PB: predicated region body
PF: predicated region fallthrough
CT: control target
= control target key end

     0   :  { %s1054_s15 = smov 0   ;;  %s1056_s16 = smov 0   ;;  %s1220_s0 = inlined_call_operand.vmem [shape: bf16[2,3,32,128], index: 0, kind: input, shape index: {}, may-alias: {0,1,2}]   ;;  %s1221_s1 = inlined_call_operand.vmem [shape: bf16[2,3,32,128], index: 1, kind: input, shape index: {}, may-alias: {0,1,2}]   ;;  %s1222_s2 = inlined_call_operand.vmem [shape: bf16[2,3,32,128], index: 2, kind: input, shape index: {}, may-alias: {0,1,2}]   ;;  %s1223_s3 = inlined_call_operand.vmem [shape: s8[2,32,128], index: 3, kind: input, shape index: {}]   ;;  %s1224_s4 = inlined_call_operand.vmem [shape: f32[2,72,128], index: 4, kind: output, shape index: {}]  }
   0x1   :  { %s1058_s17 = smov 0  }
   0x2 LB: > { %s33_s18 = sadd.s32 1, %s1022_s16  ;;  %p872_p0 = scmp.ge.s32.totalorder %s1026_s17, 1  ;;  %s1026_s17 = sphi %s1058_s17, %s14_s17   ;;  %s1022_s16 = sphi %s1056_s16, %s1226_s16   ;;  %s1018_s15 = sphi %s1054_s15, %s1225_s15  }
   0x3   : > { %p35_p1 = scmp.ge.s32.totalorder %s33_s18, 2  ;;  %p256_p2 = scmp.lt.s32.totalorder %s1026_s17, 3 }
   0x5   : > { %s1228_s18 = smov (%p35_p1, %s33_s18), 0  ;;  %p257_p3 = pnand %p872_p0, %p256_p2 }
   0x6   : > { %p320_p4 = scmp.lt.s32.totalorder (!%p257_p3), %s1018_s15, 1  ;;  %v1028_v55 = vmov (!%p257_p3), 0.0  }
   0x7   : > { %260 = sbr.rel (%p257_p3) target bundleno = 86 (0x56), region = 36 }
   0xe   : > { %s1230_s15 = smov (!%p320_p4, %s1018_s15), 1 }
   0xf   : > { %s945_s19 = smul.u32 48, %s1230_s15  ;;  %s876_s20 = sshll.u32 %s1230_s15, 3 }
  0x10   : > { %s363_s6 = scalar_lea.vmem %s1223_s3, %s876_s20  ;;  %s946_s7 = smul.u32 72, %s1230_s15 }
  0x11   : > { %s327_s23 = scalar_lea.vmem %s1220_s0, %s945_s19  ;;  %s802_s26 = scalar_lea.vmem %s1221_s1, %s945_s19  ;;  %v385_v18 = vld [vmem:[%s363_s6] sm:$0xff] }
  0x12   : > { %s807_s29 = scalar_lea.vmem %s1222_s2, %s945_s19  ;;  %v917_v0 = vld [vmem:[%s327_s23] sm:$0xff]   ;;  %v940_v1 = vld [vmem:[%s327_s23 + $0x8] sm:$0xff]   ;;  %v941_v2 = vld [vmem:[%s802_s26 + $0x10] sm:$0xff]   ;;  %v1088_v27 = vunpack.c.0.s8 %v385_v18  ;;  %v1090_v28 = vunpack.c.1.s8 %v385_v18  ;;  %v1092_v29 = vunpack.c.2.s8 %v385_v18  ;;  %v1094_v42 = vunpack.c.3.s8 %v385_v18  ;;  %s1141_s10 = scalar_lea.vmem %s1224_s4, %s946_s7 }
  0x13   : > { %v918_v3 = vunpack.c.l.bf16 %v917_v0  ;;  %v919_v4 = vunpack.c.h.bf16 %v917_v0  ;;  %v922_v5 = vunpack.c.l.bf16 %v940_v1  ;;  %v923_v6 = vunpack.c.h.bf16 %v940_v1  ;;  %v942_v7 = vld [vmem:[%s802_s26 + $0x18] sm:$0xff]   ;;  %v943_v8 = vld [vmem:[%s807_s29 + $0x20] sm:$0xff]   ;;  %v944_v9 = vld [vmem:[%s807_s29 + $0x28] sm:$0xff]  }
  0x14   : > { %v926_v10 = vunpack.c.l.bf16 %v941_v2  ;;  %v927_v11 = vunpack.c.h.bf16 %v941_v2  ;;  %v930_v12 = vunpack.c.l.bf16 %v942_v7  ;;  %v931_v13 = vunpack.c.h.bf16 %v942_v7 }
  0x15   : > { %v934_v14 = vunpack.c.l.bf16 %v943_v8  ;;  %v935_v15 = vunpack.c.h.bf16 %v943_v8  ;;  %v938_v16 = vunpack.c.l.bf16 %v944_v9  ;;  %v939_v17 = vunpack.c.h.bf16 %v944_v9 }
  0x16   : > { %v414_v19 = vmax.f32 %v918_v3, %v926_v10  ;;  %v415_v20 = vmax.f32 %v919_v4, %v927_v11  ;;  %v416_v21 = vmax.f32 %v922_v5, %v930_v12  ;;  %v417_v22 = vmax.f32 %v923_v6, %v931_v13 }
  0x17   : > { %vm625_vm0 = vcmp.eq.s32.totalorder %v1088_v27, 1  ;;  %vm626_vm1 = vcmp.eq.s32.totalorder %v1090_v28, 1  ;;  %vm627_vm2 = vcmp.eq.s32.totalorder %v1092_v29, 1  ;;  %vm628_vm3 = vcmp.eq.s32.totalorder %v1094_v42, 1 }
  0x18   : > { %v418_v23 = vmax.f32 %v414_v19, %v934_v14  ;;  %v419_v24 = vmax.f32 %v415_v20, %v935_v15  ;;  %v420_v25 = vmax.f32 %v416_v21, %v938_v16  ;;  %v421_v26 = vmax.f32 %v417_v22, %v939_v17 }
  0x19   : > { %v1101_v56 = vsel %vm625_vm0, 1.0, %v1028_v55  ;;  %v1104_v57 = vsel %vm626_vm1, 1.0, %v1028_v55  ;;  %v1107_v58 = vsel %vm627_vm2, 1.0, %v1028_v55  ;;  %vm663_vm4 = vcmp.eq.s32.totalorder %v1088_v27, 2 }
  0x1a   : > { %v422_v30 = vsub.f32 %v918_v3, %v418_v23  ;;  %v423_v31 = vsub.f32 %v919_v4, %v419_v24  ;;  %v424_v32 = vsub.f32 %v922_v5, %v420_v25  ;;  %v425_v33 = vsub.f32 %v923_v6, %v421_v26 }
  0x1b   : > { %v434_v34 = vsub.f32 %v926_v10, %v418_v23  ;;  %v435_v35 = vsub.f32 %v927_v11, %v419_v24  ;;  %v436_v36 = vsub.f32 %v930_v12, %v420_v25  ;;  %v437_v37 = vsub.f32 %v931_v13, %v421_v26 }
  0x1c   : > { %v426_v38 = vmul.f32 1.442695, %v422_v30  ;;  %v428_v39 = vmul.f32 1.442695, %v423_v31  ;;  %v430_v40 = vmul.f32 1.442695, %v424_v32  ;;  %v446_v41 = vsub.f32 %v934_v14, %v418_v23 }
  0x1d   : > { %v432_v43 = vmul.f32 1.442695, %v425_v33  ;;  %v438_v44 = vmul.f32 1.442695, %v434_v34  ;;  %v447_v45 = vsub.f32 %v935_v15, %v419_v24  ;;  %v440_v46 = vmul.f32 1.442695, %v435_v35 }
  0x1e   : > { %972 = vpow2.f32 %v426_v38  ;;  %v442_v47 = vmul.f32 1.442695, %v436_v36  ;;  %v448_v48 = vsub.f32 %v938_v16, %v420_v25  ;;  %v444_v49 = vmul.f32 1.442695, %v437_v37 }
  0x1f   : > { %974 = vpow2.f32 %v428_v39  ;;  %v449_v50 = vsub.f32 %v939_v17, %v421_v26  ;;  %v450_v51 = vmul.f32 1.442695, %v446_v41  ;;  %v452_v52 = vmul.f32 1.442695, %v447_v45 }
  0x20   : > { %976 = vpow2.f32 %v430_v40  ;;  %v454_v53 = vmul.f32 1.442695, %v448_v48  ;;  %v654_v59 = vadd.f32 %v1104_v57, %v1101_v56  ;;  %vm664_vm5 = vcmp.eq.s32.totalorder %v1090_v28, 2 }
  0x21   : > { %978 = vpow2.f32 %v432_v43  ;;  %v456_v54 = vmul.f32 1.442695, %v449_v50  ;;  %vm665_vm6 = vcmp.eq.s32.totalorder %v1092_v29, 2  ;;  %vm666_vm7 = vcmp.eq.s32.totalorder %v1094_v42, 2 }
  0x22   : > { %980 = vpow2.f32 %v438_v44  ;;  %v655_v60 = vadd.f32 %v1107_v58, %v654_v59  ;;  %v1118_v61 = vsel %vm663_vm4, 1.0, %v1028_v55  ;;  %v1121_v62 = vsel %vm664_vm5, 1.0, %v1028_v55 }
  0x23   : > { %982 = vpow2.f32 %v440_v46  ;;  %v1126_v63 = vsel %vm628_vm3, 1.0, %v1028_v55  ;;  %v1129_v0 = vsel %vm665_vm6, 1.0, %v1028_v55  ;;  %v692_v1 = vadd.f32 %v1121_v62, %v1118_v61 }
  0x24   : > { %984 = vpow2.f32 %v442_v47  ;;  %v656_v2 = vadd.f32 %v1126_v63, %v655_v60  ;;  %vm701_vm8 = vcmp.eq.s32.totalorder %v1088_v27, 3  ;;  %vm702_vm9 = vcmp.eq.s32.totalorder %v1090_v28, 3 }
  0x25   : > { %986 = vpow2.f32 %v444_v49  ;;  %v1146_v4 = vsel %vm666_vm7, 1.0, %v1028_v55  ;;  %v693_v5 = vadd.f32 %v1129_v0, %v692_v1  ;;  %vm703_vm10 = vcmp.eq.s32.totalorder %v1092_v29, 3 }
  0x26   : > { %988 = vpow2.f32 %v450_v51  ;;  %v1153_v7 = vsel %vm701_vm8, 1.0, %v1028_v55  ;;  %v1156_v8 = vsel %vm702_vm9, 1.0, %v1028_v55  ;;  %vm704_vm11 = vcmp.eq.s32.totalorder %v1094_v42, 3  ;;  %658 = vst [vmem:[%s1141_s10 + $0x10] sm:$0xff] %v656_v2 }
  0x27   : > { %990 = vpow2.f32 %v452_v52  ;;  %v694_v10 = vadd.f32 %v1146_v4, %v693_v5  ;;  %v730_v11 = vadd.f32 %v1156_v8, %v1153_v7  ;;  %v1168_v13 = vsel %vm703_vm10, 1.0, %v1028_v55 }
  0x28   : > { %v1136_v3 = vpop.eup %972  ;;  %992 = vpow2.f32 %v454_v53  ;;  %v1173_v18 = vsel %vm704_vm11, 1.0, %v1028_v55  ;;  %vm605_vm12 = vcmp.ge.s32.totalorder %v1088_v27, 0  ;;  %vm606_vm13 = vcmp.ge.s32.totalorder %v1090_v28, 0 }
  0x29   : > { %v1150_v6 = vpop.eup %974  ;;  %994 = vpow2.f32 %v456_v54  ;;  %v731_v15 = vadd.f32 %v1168_v13, %v730_v11  ;;  %696 = vst [vmem:[%s1141_s10 + $0x28] sm:$0xff] %v694_v10  ;;  %vm607_vm14 = vcmp.ge.s32.totalorder %v1092_v29, 0  ;;  %vm608_vm15 = vcmp.ge.s32.totalorder %v1094_v42, 0 }
  0x2a   : > { %v1158_v9 = vpop.eup %976  ;;  %v898_v47 = vsel %vm605_vm12, 1.0, %v1028_v55  ;;  %v899_v50 = vsel %vm606_vm13, 1.0, %v1028_v55  ;;  %v900_v52 = vsel %vm607_vm14, 1.0, %v1028_v55  ;;  %v901_v53 = vsel %vm608_vm15, 1.0, %v1028_v55 }
  0x2b   : > { %v1164_v12 = vpop.eup %978  ;;  %v732_v21 = vadd.f32 %v1173_v18, %v731_v15 }
  0x2c   : > { %v981_v14 = vpop.eup %980 }
  0x2d   : > { %v983_v16 = vpop.eup %982  ;;  %v458_v17 = vadd.f32 %v981_v14, %v1136_v3  ;;  %734 = vst [vmem:[%s1141_s10 + $0x40] sm:$0xff] %v732_v21 }
  0x2e   : > { %v985_v19 = vpop.eup %984  ;;  %v459_v20 = vadd.f32 %v983_v16, %v1150_v6 }
  0x2f   : > { %v987_v22 = vpop.eup %986  ;;  %v460_v23 = vadd.f32 %v985_v19, %v1158_v9 }
  0x30   : > { %v989_v24 = vpop.eup %988  ;;  %v461_v25 = vadd.f32 %v987_v22, %v1164_v12 }
  0x31   : > { %v991_v26 = vpop.eup %990  ;;  %v462_v30 = vadd.f32 %v989_v24, %v458_v17 }
  0x32   : > { %v993_v31 = vpop.eup %992  ;;  %v463_v32 = vadd.f32 %v991_v26, %v459_v20 }
  0x33   : > { %v995_v33 = vpop.eup %994  ;;  %v464_v34 = vadd.f32 %v993_v31, %v460_v23  ;;  %996 = vrcp.f32 %v462_v30 }
  0x34   : > { %v465_v35 = vadd.f32 %v995_v33, %v461_v25  ;;  %998 = vrcp.f32 %v463_v32 }
  0x35   : > { %1000 = vrcp.f32 %v464_v34 }
  0x36   : > { %1002 = vrcp.f32 %v465_v35 }
  0x3d   : > { %v997_v36 = vpop.eup %996 }
  0x3e   : > { %v999_v37 = vpop.eup %998  ;;  %v470_v38 = vmul.f32 %v997_v36, %v462_v30 }
  0x3f   : > { %v1001_v39 = vpop.eup %1000  ;;  %v471_v40 = vmul.f32 %v999_v37, %v463_v32 }
  0x40   : > { %v1003_v41 = vpop.eup %1002  ;;  %v472_v43 = vmul.f32 %v1001_v39, %v464_v34  ;;  %v474_v44 = vsub.f32 2.0, %v470_v38 }
  0x41   : > { %v473_v45 = vmul.f32 %v1003_v41, %v465_v35  ;;  %v475_v46 = vsub.f32 2.0, %v471_v40 }
  0x42   : > { %v476_v48 = vsub.f32 2.0, %v472_v43  ;;  %v478_v49 = vmul.f32 %v997_v36, %v474_v44 }
  0x43   : > { %v477_v27 = vsub.f32 2.0, %v473_v45  ;;  %v479_v51 = vmul.f32 %v999_v37, %v475_v46 }
  0x44   : > { %v480_v28 = vmul.f32 %v1001_v39, %v476_v48  ;;  %v617_v54 = vmul.f32 %v898_v47, %v478_v49 }
  0x45   : > { %v481_v59 = vmul.f32 %v1003_v41, %v477_v27  ;;  %v618_v29 = vmul.f32 %v899_v50, %v479_v51 }
  0x46   : > { %v619_v60 = vmul.f32 %v900_v52, %v480_v28  ;;  %v621_v1 = vmul.f32 %v1136_v3, %v617_v54  ;;  %v659_v42 = vmul.f32 %v981_v14, %v617_v54  ;;  %v697_v2 = vmul.f32 %v989_v24, %v617_v54 }
  0x47   : > { %v620_v5 = vmul.f32 %v901_v53, %v481_v59  ;;  %v622_v10 = vmul.f32 %v1150_v6, %v618_v29  ;;  %v660_v11 = vmul.f32 %v983_v16, %v618_v29  ;;  %v698_v15 = vmul.f32 %v991_v26, %v618_v29 }
  0x48   : > { %v623_v17 = vmul.f32 %v1158_v9, %v619_v60  ;;  %v638_v20 = vmul.f32 %v1101_v56, %v621_v1  ;;  %v661_v21 = vmul.f32 %v985_v19, %v619_v60  ;;  %v676_v55 = vmul.f32 %v1118_v61, %v659_v42 }
  0x49   : > { %v624_v23 = vmul.f32 %v1164_v12, %v620_v5  ;;  %v639_v25 = vmul.f32 %v1104_v57, %v622_v10  ;;  %v648_v30 = vadd.f32 %v622_v10, %v621_v1  ;;  %v662_v3 = vmul.f32 %v987_v22, %v620_v5 }
  0x4a   : > { %v640_v14 = vmul.f32 %v1107_v58, %v623_v17  ;;  %v677_v24 = vmul.f32 %v1121_v62, %v660_v11  ;;  %v678_v6 = vmul.f32 %v1129_v0, %v661_v21  ;;  %v686_v16 = vadd.f32 %v660_v11, %v659_v42 }
  0x4b   : > { %v641_v9 = vmul.f32 %v1126_v63, %v624_v23  ;;  %v642_v26 = vadd.f32 %v639_v25, %v638_v20  ;;  %v649_v56 = vadd.f32 %v648_v30, %v623_v17  ;;  %v679_v19 = vmul.f32 %v1146_v4, %v662_v3 }
  0x4c   : > { %v680_v61 = vadd.f32 %v677_v24, %v676_v55  ;;  %v687_v12 = vadd.f32 %v686_v16, %v661_v21  ;;  %v699_v32 = vmul.f32 %v993_v31, %v619_v60  ;;  %v700_v57 = vmul.f32 %v995_v33, %v620_v5 }
  0x4d   : > { %v643_v22 = vadd.f32 %v642_v26, %v640_v14  ;;  %v650_v58 = vadd.f32 %v649_v56, %v624_v23  ;;  %v714_v62 = vmul.f32 %v1153_v7, %v697_v2  ;;  %v715_v0 = vmul.f32 %v1156_v8, %v698_v15 }
  0x4e   : > { %v681_v34 = vadd.f32 %v680_v61, %v678_v6  ;;  %v688_v63 = vadd.f32 %v687_v12, %v662_v3  ;;  %v716_v4 = vmul.f32 %v1168_v13, %v699_v32  ;;  %v717_v35 = vmul.f32 %v1173_v18, %v700_v57 }
  0x4f   : > { %v644_v36 = vadd.f32 %v643_v22, %v641_v9  ;;  %v718_v31 = vadd.f32 %v715_v0, %v714_v62  ;;  %v724_v33 = vadd.f32 %v698_v15, %v697_v2  ;;  %652 = vst [vmem:[%s1141_s10 + $0x8] sm:$0xff] %v650_v58 }
  0x50   : > { %v682_v37 = vadd.f32 %v681_v34, %v679_v19  ;;  %690 = vst [vmem:[%s1141_s10 + $0x20] sm:$0xff] %v688_v63 }
  0x51   : > { %v719_v38 = vadd.f32 %v718_v31, %v716_v4  ;;  %v725_v39 = vadd.f32 %v724_v33, %v699_v32  ;;  %646 = vst [vmem:[%s1141_s10] sm:$0xff] %v644_v36 }
  0x52   : > { %684 = vst [vmem:[%s1141_s10 + $0x18] sm:$0xff] %v682_v37 }
  0x53   : > { %v720_v7 = vadd.f32 %v719_v38, %v717_v35  ;;  %v726_v8 = vadd.f32 %v725_v39, %v700_v57 }
  0x55   : > { %722 = vst [vmem:[%s1141_s10 + $0x30] sm:$0xff] %v720_v7  ;;  %728 = vst [vmem:[%s1141_s10 + $0x38] sm:$0xff] %v726_v8 }
  0x56 PF: > { %s14_s17 = sadd.s32 1, %s1026_s17   ;;  %s1225_s15 = smov %s1022_s16 }
  0x57   : > { %p11_p5 = scmp.ge.s32.totalorder %s14_s17, 4   ;;  %s1226_s16 = smov %s1228_s18 }
  0x59   :  { %13 = sbr.rel (!%p11_p5) target bundleno = 2 (0x2), region = 87 }

</bundles_post_ra>
